<compile_context>
chip_gen: v7x
topology: tpu7x:2x2x1
jax: 0.10.0
libtpu: 0.0.40
codegen_flags: <defaults>
</compile_context>

<pallas_src>
import jax
import jax.numpy as jnp
from jax import lax
from jax.experimental import pallas as pl
from jax.experimental.pallas import tpu as pltpu

_LANES = 128        # vreg lane width
_ACC_ROWS = 8       # f32 accumulator sublane height
_CHUNK_ROWS = 128   # inner-loop row chunk: (128,128) f32 = 16 vregs/operand -> no spills


def _round_up(x, m):
    return (x + m - 1) // m * m


def _sublane_pack(dtype):
    # rows-per-vreg packing: f32 -> 8, bf16/f16 -> 16, int8/fp8 -> 32
    return max(8, 32 // jnp.dtype(dtype).itemsize)


def _default_block_rows():
    # v5e (and older): 16 MiB default scoped VMEM -> 3 inputs x 2 bufs x 1 MiB = 6 MiB.
    # v6e/v7x: 32 MiB scoped default, faster HBM -> 2 MiB/operand/buffer (12 MiB total)
    # drops the per-grid-step overhead below ~10%.
    try:
        kind = jax.devices()[0].device_kind.lower()
    except Exception:
        return 2048
    if any(v in kind for v in ("v2", "v3", "v4", "v5")):
        return 2048
    return 4096


def _make_kernel(masked, full_chunks, rem, steps, block_rows, need_mask, last_valid):
    """Build a kernel specialized on static tiling parameters.

    masked      : include the gt_conf >= 0.01 mask and an element-count output.
    full_chunks : number of full (_CHUNK_ROWS, 128) chunks per grid block.
    rem         : leftover rows (< _CHUNK_ROWS) of a single-step (full-array) block.
    need_mask   : last grid block is ragged -> rows >= valid row count hold garbage
                  (Pallas edge blocks are unspecified) and must be masked out.
    """

    def kernel(*refs):
        if masked:
            pred_ref, gt_ref, conf_ref, sq_out, cnt_out = refs
        else:
            pred_ref, gt_ref, sq_out = refs
            conf_ref = cnt_out = None

        if need_mask:
            valid_rows = jnp.where(pl.program_id(0) == steps - 1,
                                   jnp.int32(last_valid), jnp.int32(block_rows))
        else:
            valid_rows = None

        def accum(r0, nrows, sq_acc, cnt_acc):
            p = pred_ref[pl.ds(r0, nrows), :].astype(jnp.float32)
            g = gt_ref[pl.ds(r0, nrows), :].astype(jnp.float32)
            d = p - g
            sq = d * d
            if masked:
                m = conf_ref[pl.ds(r0, nrows), :].astype(jnp.float32) >= jnp.float32(0.01)
                if need_mask:
                    row_ids = r0 + lax.broadcasted_iota(jnp.int32, (nrows, _LANES), 0)
                    m = m & (row_ids < valid_rows)
                sq = jnp.where(m, sq, jnp.float32(0.0))
                cnt_acc = cnt_acc + jnp.sum(
                    m.astype(jnp.float32).reshape(nrows // _ACC_ROWS, _ACC_ROWS, _LANES),
                    axis=0)
            elif need_mask:
                row_ids = r0 + lax.broadcasted_iota(jnp.int32, (nrows, _LANES), 0)
                sq = jnp.where(row_ids < valid_rows, sq, jnp.float32(0.0))
            # (nrows,128) -> (nrows/8, 8, 128); sum over leading dim = pure vreg adds.
            sq_acc = sq_acc + jnp.sum(
                sq.reshape(nrows // _ACC_ROWS, _ACC_ROWS, _LANES), axis=0)
            return sq_acc, cnt_acc

        zero = jnp.zeros((_ACC_ROWS, _LANES), jnp.float32)
        sq_acc, cnt_acc = zero, zero
        if full_chunks > 0:
            def body(c, carry):
                r0 = pl.multiple_of(c * _CHUNK_ROWS, _CHUNK_ROWS)
                return accum(r0, _CHUNK_ROWS, *carry)
            sq_acc, cnt_acc = lax.fori_loop(0, full_chunks, body, (sq_acc, cnt_acc))
        if rem > 0:
            sq_acc, cnt_acc = accum(full_chunks * _CHUNK_ROWS, rem, sq_acc, cnt_acc)

        if steps == 1:
            sq_out[...] = sq_acc
            if masked:
                cnt_out[...] = cnt_acc
        else:
            @pl.when(pl.program_id(0) == 0)
            def _init():
                sq_out[...] = jnp.zeros_like(sq_out)
                if masked:
                    cnt_out[...] = jnp.zeros_like(cnt_out)
            sq_out[...] += sq_acc
            if masked:
                cnt_out[...] += cnt_acc

    return kernel


def _repack(x, rows):
    """Present x as a lane-dense (rows, 128) slab.

    If x.size == rows*128 (aligned n) this is a pure metadata reshape -- zero HBM copy.
    Otherwise zeros are appended up to the next sublane-pack multiple of 128; padded
    elements contribute 0 squared error and conf=0 (never selected).
    """
    flat = x.reshape(-1)
    need = rows * _LANES
    if int(flat.shape[0]) != need:
        # TODO(synk): a fully copy-free path for ragged n would need a manual-DMA 1-D
        # kernel; this pad still costs one extra read+write of the (ragged) input.
        flat = jnp.pad(flat, (0, need - int(flat.shape[0])))
    return flat.reshape(rows, _LANES)


def keypoint_loss(pred_seq, gt_seq, gt_conf=None, *, block_rows=None):
    """Masked-mean MSE matching KeypointLoss.forward (gt_conf=None -> plain MSE)."""
    n = int(pred_seq.size)
    masked = gt_conf is not None

    if block_rows is None:
        block_rows = _default_block_rows()
    block_rows = max(_CHUNK_ROWS, _round_up(int(block_rows), _CHUNK_ROWS))

    dtypes = [pred_seq.dtype, gt_seq.dtype] + ([gt_conf.dtype] if masked else [])
    pack = max(_sublane_pack(d) for d in dtypes)

    # rows of 128 lanes, rounded only to the dtype sublane packing (not to block
    # granularity): the last grid block may be ragged and is masked in-kernel.
    rows = _round_up(pl.cdiv(n, _LANES), pack)

    if rows <= block_rows:
        br, steps = rows, 1                      # single full-array block
    else:
        br, steps = block_rows, pl.cdiv(rows, block_rows)
    full_chunks, rem = divmod(br, _CHUNK_ROWS)   # rem only occurs in the 1-step case
    need_mask = steps * br != rows               # ragged last block -> mask garbage rows
    last_valid = rows - (steps - 1) * br

    in_spec = pl.BlockSpec((br, _LANES), lambda s: (s, 0))
    out_spec = pl.BlockSpec((_ACC_ROWS, _LANES), lambda s: (0, 0))   # resident accumulator
    acc_shape = jax.ShapeDtypeStruct((_ACC_ROWS, _LANES), jnp.float32)
    cparams = pltpu.CompilerParams(dimension_semantics=("arbitrary",))
    # TODO(synk): on v7x (2 TensorCores) add a leading CORE_PARALLEL axis of size 2
    # with per-core partial accumulators to drive both cores' HBM paths.

    n_out = 2 if masked else 1
    cost = pl.CostEstimate(
        flops=(6 if masked else 3) * n,
        transcendentals=0,
        bytes_accessed=rows * _LANES * sum(jnp.dtype(d).itemsize for d in dtypes)
        + n_out * _ACC_ROWS * _LANES * 4)

    kernel = _make_kernel(masked, full_chunks, rem, steps, br, need_mask, last_valid)
    pred2 = _repack(pred_seq, rows)
    gt2 = _repack(gt_seq, rows)

    if not masked:
        sq = pl.pallas_call(
            kernel,
            out_shape=acc_shape,
            grid_spec=pltpu.PrefetchScalarGridSpec(
                num_scalar_prefetch=0, grid=(steps,),
                in_specs=[in_spec, in_spec], out_specs=out_spec),
            compiler_params=cparams,
            cost_estimate=cost,
        )(pred2, gt2)
        return jnp.sum(sq) / jnp.float32(n)

    conf2 = _repack(gt_conf, rows)
    sq, cnt = pl.pallas_call(
        kernel,
        out_shape=(acc_shape, acc_shape),
        grid_spec=pltpu.PrefetchScalarGridSpec(
            num_scalar_prefetch=0, grid=(steps,),
            in_specs=[in_spec, in_spec, in_spec], out_specs=(out_spec, out_spec)),
        compiler_params=cparams,
        cost_estimate=cost,
    )(pred2, gt2, conf2)
    # mean = sum / count (count == 0 -> NaN, same as torch mean over an empty selection)
    return jnp.sum(sq) / jnp.sum(cnt)


if __name__ == "__main__":
    key = jax.random.PRNGKey(0)
    k1, k2, k3 = jax.random.split(key, 3)

    # pred_seq / gt_seq / gt_conf: (batch=2, seq=8, keypoint_dim=32)
    pred_seq = jax.random.normal(k1, (2, 8, 32), dtype=jnp.float32)
    gt_seq = jax.random.normal(k2, (2, 8, 32), dtype=jnp.float32)
    gt_conf = jax.random.uniform(k3, (2, 8, 32), dtype=jnp.float32)  # ~99% >= 0.01

    loss_masked = jax.block_until_ready(keypoint_loss(pred_seq, gt_seq, gt_conf))
    loss_plain = jax.block_until_ready(keypoint_loss(pred_seq, gt_seq, None))

    mask = gt_conf >= 0.01
    diff2 = (pred_seq - gt_seq) ** 2
    ref_masked = jnp.sum(jnp.where(mask, diff2, 0.0)) / jnp.sum(mask.astype(jnp.float32))
    ref_plain = jnp.mean(diff2)
    assert jnp.allclose(loss_masked, ref_masked, rtol=1e-5, atol=1e-6), (loss_masked, ref_masked)
    assert jnp.allclose(loss_plain, ref_plain, rtol=1e-5, atol=1e-6), (loss_plain, ref_plain)

    # Aligned size (n % 1024 == 0): exercises the zero-copy (no pad) path.
    ka, kb, kc = jax.random.split(jax.random.PRNGKey(1), 3)
    p2 = jax.random.normal(ka, (8, 32, 128), dtype=jnp.float32)
    g2 = jax.random.normal(kb, (8, 32, 128), dtype=jnp.float32)
    c2 = jax.random.uniform(kc, (8, 32, 128), dtype=jnp.float32)
    m2 = c2 >= 0.01
    ref2 = jnp.sum(jnp.where(m2, (p2 - g2) ** 2, 0.0)) / jnp.sum(m2.astype(jnp.float32))
    got2 = jax.block_until_ready(keypoint_loss(p2, g2, c2))
    assert jnp.allclose(got2, ref2, rtol=1e-4, atol=1e-6), (got2, ref2)

    # Ragged size + small block_rows: forces the multi-step path with an in-kernel
    # masked ragged last block (both masked and plain kernels).
    kd, ke, kf = jax.random.split(jax.random.PRNGKey(2), 3)
    p3 = jax.random.normal(kd, (2, 600, 130), dtype=jnp.float32)
    g3 = jax.random.normal(ke, (2, 600, 130), dtype=jnp.float32)
    c3 = jax.random.uniform(kf, (2, 600, 130), dtype=jnp.float32)
    m3 = c3 >= 0.01
    ref3 = jnp.sum(jnp.where(m3, (p3 - g3) ** 2, 0.0)) / jnp.sum(m3.astype(jnp.float32))
    got3 = jax.block_until_ready(keypoint_loss(p3, g3, c3, block_rows=512))
    assert jnp.allclose(got3, ref3, rtol=1e-4, atol=1e-6), (got3, ref3)
    ref3p = jnp.mean((p3 - g3) ** 2)
    got3p = jax.block_until_ready(keypoint_loss(p3, g3, None, block_rows=512))
    assert jnp.allclose(got3p, ref3p, rtol=1e-4, atol=1e-6), (got3p, ref3p)

    # bf16 inputs: cast happens inside the kernel; rows rounded to the 16-row packing.
    pred_bf = pred_seq.astype(jnp.bfloat16)
    gt_bf = gt_seq.astype(jnp.bfloat16)
    conf_bf = gt_conf.astype(jnp.bfloat16)
    loss_bf = jax.block_until_ready(keypoint_loss(pred_bf, gt_bf, conf_bf))
    m_bf = conf_bf.astype(jnp.float32) >= 0.01
    d_bf = (pred_bf.astype(jnp.float32) - gt_bf.astype(jnp.float32)) ** 2
    ref_bf = jnp.sum(jnp.where(m_bf, d_bf, 0.0)) / jnp.sum(m_bf.astype(jnp.float32))
    assert jnp.allclose(loss_bf, ref_bf, rtol=1e-4, atol=1e-5), (loss_bf, ref_bf)

    print("KERNEL_OK")
</pallas_src>

<mosaic_0001>
module attributes {stable_mosaic.version = 11 : i64} {
  func.func @kernel(%arg0: i32, %arg1: memref<8x128xf32, #tpu.memory_space<vmem>>, %arg2: memref<8x128xf32, #tpu.memory_space<vmem>>, %arg3: memref<8x128xf32, #tpu.memory_space<vmem>>, %arg4: memref<8x128xf32, #tpu.memory_space<vmem>>, %arg5: memref<8x128xf32, #tpu.memory_space<vmem>>) attributes {dimension_semantics = [#tpu.dimension_semantics<arbitrary>], iteration_bounds = array<i64: 1>, scalar_prefetch = 0 : i64, scratch_operands = 0 : i64, tpu.core_type = #tpu.core_type<tc>, window_params = [{transform_indices = @transform_0, window_bounds = array<i64: 8, 128>}, {transform_indices = @transform_1, window_bounds = array<i64: 8, 128>}, {transform_indices = @transform_2, window_bounds = array<i64: 8, 128>}, {pipeline_mode = #tpu.pipeline_mode<synchronous>, transform_indices = @transform_3, window_bounds = array<i64: 8, 128>}, {pipeline_mode = #tpu.pipeline_mode<synchronous>, transform_indices = @transform_4, window_bounds = array<i64: 8, 128>}]} {
    %cst = arith.constant 0.000000e+00 : f32
    %0 = vector.broadcast %cst : f32 to vector<8x128xf32>
    %c0 = arith.constant 0 : index
    %c0_0 = arith.constant 0 : index
    %1 = vector.load %arg1[%c0, %c0_0] : memref<8x128xf32, #tpu.memory_space<vmem>>, vector<8x128xf32>
    %c0_1 = arith.constant 0 : index
    %c0_2 = arith.constant 0 : index
    %2 = vector.load %arg2[%c0_1, %c0_2] : memref<8x128xf32, #tpu.memory_space<vmem>>, vector<8x128xf32>
    %3 = arith.subf %1, %2 : vector<8x128xf32>
    %4 = arith.mulf %3, %3 : vector<8x128xf32>
    %c0_3 = arith.constant 0 : index
    %c0_4 = arith.constant 0 : index
    %5 = vector.load %arg3[%c0_3, %c0_4] : memref<8x128xf32, #tpu.memory_space<vmem>>, vector<8x128xf32>
    %cst_5 = arith.constant 0.00999999977 : f32
    %6 = vector.broadcast %cst_5 : f32 to vector<8x128xf32>
    %7 = arith.cmpf oge, %5, %6 : vector<8x128xf32>
    %cst_6 = arith.constant 0.000000e+00 : f32
    %8 = vector.broadcast %cst_6 : f32 to vector<8x128xf32>
    %9 = arith.select %7, %4, %8 : vector<8x128xi1>, vector<8x128xf32>
    %10 = arith.extui %7 : vector<8x128xi1> to vector<8x128xi32>
    %11 = arith.sitofp %10 : vector<8x128xi32> to vector<8x128xf32>
    %12 = vector.shape_cast %11 : vector<8x128xf32> to vector<1x8x128xf32>
    %cst_7 = arith.constant dense<0.000000e+00> : vector<8x128xf32>
    %13 = vector.multi_reduction <add>, %12, %cst_7 [0] : vector<1x8x128xf32> to vector<8x128xf32>
    %14 = arith.addf %0, %13 : vector<8x128xf32>
    %15 = vector.shape_cast %9 : vector<8x128xf32> to vector<1x8x128xf32>
    %cst_8 = arith.constant dense<0.000000e+00> : vector<8x128xf32>
    %16 = vector.multi_reduction <add>, %15, %cst_8 [0] : vector<1x8x128xf32> to vector<8x128xf32>
    %17 = arith.addf %0, %16 : vector<8x128xf32>
    %c0_9 = arith.constant 0 : index
    %c0_10 = arith.constant 0 : index
    %18 = vector.load %arg4[%c0_9, %c0_10] : memref<8x128xf32, #tpu.memory_space<vmem>>, vector<8x128xf32>
    tpu.vector_store %arg4[%c0_9, %c0_10], %17 {strides = array<i32>} : memref<8x128xf32, #tpu.memory_space<vmem>>, vector<8x128xf32>,
    %c0_11 = arith.constant 0 : index
    %c0_12 = arith.constant 0 : index
    %19 = vector.load %arg5[%c0_11, %c0_12] : memref<8x128xf32, #tpu.memory_space<vmem>>, vector<8x128xf32>
    tpu.vector_store %arg5[%c0_11, %c0_12], %14 {strides = array<i32>} : memref<8x128xf32, #tpu.memory_space<vmem>>, vector<8x128xf32>,
    return
  }
  func.func @transform_0(%arg0: i32) -> (i32, i32) {
    %c0_i32 = arith.constant 0 : i32
    %c0_i32_0 = arith.constant 0 : i32
    return %arg0, %c0_i32 : i32, i32
  }
  func.func @transform_1(%arg0: i32) -> (i32, i32) {
    %c0_i32 = arith.constant 0 : i32
    %c0_i32_0 = arith.constant 0 : i32
    return %arg0, %c0_i32 : i32, i32
  }
  func.func @transform_2(%arg0: i32) -> (i32, i32) {
    %c0_i32 = arith.constant 0 : i32
    %c0_i32_0 = arith.constant 0 : i32
    return %arg0, %c0_i32 : i32, i32
  }
  func.func @transform_3(%arg0: i32) -> (i32, i32) {
    %c0_i32 = arith.constant 0 : i32
    %c0_i32_0 = arith.constant 0 : i32
    %c0_i32_1 = arith.constant 0 : i32
    return %c0_i32, %c0_i32_0 : i32, i32
  }
  func.func @transform_4(%arg0: i32) -> (i32, i32) {
    %c0_i32 = arith.constant 0 : i32
    %c0_i32_0 = arith.constant 0 : i32
    %c0_i32_1 = arith.constant 0 : i32
    return %c0_i32, %c0_i32_0 : i32, i32
  }
}

</mosaic_0001>

<bundles_post_ra>
// kernel: tpu_custom_call.1
= control target key start
LH: loop header
LB: loop body
LE: loop exit
PB: predicated region body
PF: predicated region fallthrough
CT: control target
= control target key end

     0   :  { %10 = vsyncpa [#allocation3], 0  ;;  %s316_s0 = inlined_call_operand.hbm [shape: f32[8,128], index: 0, kind: input, shape index: {}]   ;;  %s317_s1 = inlined_call_operand.hbm [shape: f32[8,128], index: 1, kind: input, shape index: {}]   ;;  %s318_s2 = inlined_call_operand.hbm [shape: f32[8,128], index: 2, kind: input, shape index: {}]   ;;  %s319_s3 = inlined_call_operand.hbm [shape: f32[8,128], index: 3, kind: output, shape index: {0}]   ;;  %s320_s4 = inlined_call_operand.hbm [shape: f32[8,128], index: 4, kind: output, shape index: {1}]  }
   0x1   :  { %11 = vsyncpa [#allocation6], 0 }
   0x2   :  { %12 = vsyncpa [#allocation4], 0 }
   0x3   :  { %13 = vsyncpa [#allocation10], 0  ;;  %s223_s15 = smov [#allocation5]   ;;  %s224_s17 = smov [#allocation2]  }
   0x4   :  { %s30_s16 = sshll.u32 %s223_s15, 4  ;;  %s20_s18 = sshll.u32 %s224_s17, 4  ;;  %s31_s16 = int_to_ptr.vmem [resolvable:$true] %s30_s16  ;;  %s21_s18 = int_to_ptr.vmem [resolvable:$true] %s20_s18 }
   0x5   :  { %s105_s21 = scalar_lea.hbm %s317_s1, 128 }
   0x6   :  { %p106_p0 = scmp.ne.s32.totalorder %s317_s1, %s105_s21  ;;  %p109_p1 = scmp.lt.u32.totalorder %s105_s21, %s317_s1 }
   0x8   :  { %p111_p2 = pnand %p109_p1, %p106_p0 }
   0xa   :  { %114 = shalt.err (!%p111_p2)
}
   0xb   :  { %s115_s26 = scalar_lea.vmem %s31_s16, 128  ;;  %p120_p4 = scmp.lt.s32.totalorder %s31_s16, %s31_s16 }
   0xc   :  { %p116_p3 = scmp.ne.s32.totalorder %s31_s16, %s115_s26  ;;  %p121_p5 = scmp.lt.s32.totalorder %s115_s26, %s115_s26 }
   0xe   :  { %p122_p6 = por %p121_p5, %p120_p4 }
  0x10   :  { %p123_p7 = pnand %p122_p6, %p116_p3 }
  0x12   :  { %126 = shalt.err (!%p123_p7)
}
  0x13   :  { %33 = dma.hbm_to_vmem [thread:$0]  %s317_s1, 128, %s31_s16, [#allocation6]  }
  0x14   :  { %s127_s5 = scalar_lea.hbm %s316_s0, 128 }
  0x15   :  { %p128_p8 = scmp.ne.s32.totalorder %s316_s0, %s127_s5  ;;  %p131_p9 = scmp.lt.u32.totalorder %s127_s5, %s316_s0 }
  0x17   :  { %p133_p10 = pnand %p131_p9, %p128_p8 }
  0x19   :  { %136 = shalt.err (!%p133_p10)
}
  0x1a   :  { %s137_s10 = scalar_lea.vmem %s21_s18, 128  ;;  %p142_p12 = scmp.lt.s32.totalorder %s21_s18, %s21_s18 }
  0x1b   :  { %p138_p11 = scmp.ne.s32.totalorder %s21_s18, %s137_s10  ;;  %p143_p13 = scmp.lt.s32.totalorder %s137_s10, %s137_s10 }
  0x1d   :  { %p144_p0 = por %p143_p13, %p142_p12 }
  0x1f   :  { %p145_p1 = pnand %p144_p0, %p138_p11 }
  0x21   :  { %148 = shalt.err (!%p145_p1)
}
  0x22   :  { %23 = dma.hbm_to_vmem [thread:$0]  %s316_s0, 128, %s21_s18, [#allocation3]  }
  0x23   :  { %s225_s12 = smov [#allocation7]   ;;  %s149_s16 = scalar_lea.hbm %s318_s2, 128 }
  0x24   :  { %s40_s13 = sshll.u32 %s225_s12, 4  ;;  %p150_p2 = scmp.ne.s32.totalorder %s318_s2, %s149_s16  ;;  %s41_s13 = int_to_ptr.vmem [resolvable:$true] %s40_s13 }
  0x25   :  { %p153_p3 = scmp.lt.u32.totalorder %s149_s16, %s318_s2 }
  0x27   :  { %p155_p4 = pnand %p153_p3, %p150_p2 }
  0x29   :  { %158 = shalt.err (!%p155_p4)
}
  0x2a   :  { %s159_s22 = scalar_lea.vmem %s41_s13, 128  ;;  %p164_p6 = scmp.lt.s32.totalorder %s41_s13, %s41_s13 }
  0x2b   :  { %p160_p5 = scmp.ne.s32.totalorder %s41_s13, %s159_s22  ;;  %p165_p7 = scmp.lt.s32.totalorder %s159_s22, %s159_s22 }
  0x2d   :  { %p166_p8 = por %p165_p7, %p164_p6 }
  0x2f   :  { %p167_p9 = pnand %p166_p8, %p160_p5 }
  0x31   :  { %170 = shalt.err (!%p167_p9)
}
  0x32   :  { %43 = dma.hbm_to_vmem [thread:$0]  %s318_s2, 128, %s41_s13, [#allocation6]  }
  0x33   :  { %215 = dma.done.wait [#allocation3], 128  }
  0x34   :  { %216 = vsyncadd [#allocation3], 4294967168 }
  0x35   :  { %217 = dma.done.wait [#allocation6], 256  }
  0x36   :  { %218 = vsyncadd [#allocation6], 4294967040  ;;  %s226_s23 = smov [#allocation9]   ;;  %v53_v0 = vld [vmem:[#allocation2] sm:$0xff]  ;;  %v54_v1 = vld [vmem:[#allocation5] sm:$0xff]  ;;  %s227_s25 = smov [#allocation8]  }
  0x37   :  { %s84_s24 = sshll.u32 %s226_s23, 4  ;;  %v57_v2 = vld [vmem:[#allocation7] sm:$0xff]  ;;  %s74_s26 = sshll.u32 %s227_s25, 4  ;;  %v55_v3 = vsub.f32 %v53_v0, %v54_v1  ;;  %v228_v4 = vmov 0.0   ;;  %s85_s24 = int_to_ptr.vmem [resolvable:$true] %s84_s24  ;;  %s75_s26 = int_to_ptr.vmem [resolvable:$true] %s74_s26 }
  0x38   :  { %vm58_vm0 = vcmp.ge.f32.partialorder %v57_v2, 0.01  ;;  %s171_s2 = scalar_lea.vmem %s85_s24, 128  ;;  %p176_p11 = scmp.lt.s32.totalorder %s85_s24, %s85_s24 }
  0x39   :  { %v98_v5 = vsel %vm58_vm0, 1.0, %v228_v4  ;;  %v56_v6 = vmul.f32 %v55_v3, %v55_v3  ;;  %p172_p10 = scmp.ne.s32.totalorder %s85_s24, %s171_s2  ;;  %p177_p12 = scmp.lt.s32.totalorder %s171_s2, %s171_s2 }
  0x3a   :  { %67 = vst [vmem:[#allocation9] sm:$0xff] %v98_v5 }
  0x3b   :  { %p178_p13 = por %p177_p12, %p176_p11 }
  0x3d   :  { %p179_p0 = pnand %p178_p13, %p172_p10 }
  0x3f   :  { %182 = shalt.err (!%p179_p0)
}
  0x40   :  { %s183_s29 = scalar_lea.hbm %s320_s4, 128 }
  0x41   :  { %p184_p1 = scmp.ne.s32.totalorder %s320_s4, %s183_s29  ;;  %p187_p2 = scmp.lt.u32.totalorder %s183_s29, %s320_s4 }
  0x43   :  { %p189_p3 = pnand %p187_p2, %p184_p1 }
  0x45   :  { %192 = shalt.err (!%p189_p3)
}
  0x46   :  { %87 = dma.vmem_to_hbm [thread:$0]  %s85_s24, 128, %s320_s4, [#allocation10]   ;;  %v59_v7 = vsel %vm58_vm0, %v56_v6, 0.0 }
  0x47   :  { %66 = vst [vmem:[#allocation8] sm:$0xff] %v59_v7  ;;  %s193_s10 = scalar_lea.vmem %s75_s26, 128  ;;  %p198_p5 = scmp.lt.s32.totalorder %s75_s26, %s75_s26 }
  0x48   :  { %p194_p4 = scmp.ne.s32.totalorder %s75_s26, %s193_s10  ;;  %p199_p6 = scmp.lt.s32.totalorder %s193_s10, %s193_s10 }
  0x4a   :  { %p200_p7 = por %p199_p6, %p198_p5 }
  0x4c   :  { %p201_p8 = pnand %p200_p7, %p194_p4 }
  0x4e   :  { %204 = shalt.err (!%p201_p8)
}
  0x4f   :  { %s205_s12 = scalar_lea.hbm %s319_s3, 128 }
  0x50   :  { %p206_p9 = scmp.ne.s32.totalorder %s319_s3, %s205_s12  ;;  %p209_p10 = scmp.lt.u32.totalorder %s205_s12, %s319_s3 }
  0x52   :  { %p211_p11 = pnand %p209_p10, %p206_p9 }
  0x54   :  { %214 = shalt.err (!%p211_p11)
}
  0x55   :  { %77 = dma.vmem_to_hbm [thread:$0]  %s75_s26, 128, %s319_s3, [#allocation4]  }
  0x56   :  { %219 = dma.done.wait [#allocation4], 128  }
  0x57   :  { %220 = vsyncadd [#allocation4], 4294967168 }
  0x58   :  { %221 = dma.done.wait [#allocation10], 128  }
  0x59   :  { %222 = vsyncadd [#allocation10], 4294967168 }
  0x5a   :  { %94 = vsyncpa [#allocation3], 1 }
  0x5b   :  { %95 = vsyncpa [#allocation6], 1 }
  0x5c   :  { %96 = vsyncpa [#allocation4], 1 }
  0x5d   :  { %97 = vsyncpa [#allocation10], 1 }

</bundles_post_ra>
